<compile_context>
chip_gen: v7x
topology: tpu7x:2x2x1
jax: 0.10.0
libtpu: 0.0.40
codegen_flags: <defaults>
</compile_context>

<pallas_src>
import jax
import jax.numpy as jnp
from jax.experimental import pallas as pl
from jax.experimental.pallas import tpu as pltpu

IN_DIM = 7
HID_DIM = 150
HID_PAD = 256          # 150 zero-padded to 2 x 128 lanes
OUT_DIM = 7
MAX_TILE = 1024        # batch-lane tile per grid step (multiple of 128)


def _round_up(n, m):
    return ((n + m - 1) // m) * m


def _mlp_kernel(xt_ref, w1t_ref, b1_ref, w2t_ref, b2_ref, o_ref):
    # xt:  (IN_DIM,  TB)   batch on lanes (lane-dense)
    # w1t: (HID_PAD, IN_DIM)
    # b1:  (HID_PAD, 1)
    # w2t: (OUT_DIM, HID_PAD)
    # b2:  (OUT_DIM, 1)
    # o:   (OUT_DIM, TB)
    xt = xt_ref[...]
    w1t = w1t_ref[...]
    b1 = b1_ref[...]
    w2t = w2t_ref[...]
    b2 = b2_ref[...]

    z1 = jnp.dot(w1t, xt, preferred_element_type=jnp.float32) + b1    # (HID_PAD, TB)
    h = jax.nn.sigmoid(z1)                                            # EUP exp + recip
    out = jnp.dot(w2t, h, preferred_element_type=jnp.float32) + b2    # (OUT_DIM, TB)
    o_ref[...] = out.astype(o_ref.dtype)


def logistic_model_forward(x, w1, b1, w2, b2):
    """x: (B, 7) float32; w1: (7,150); b1: (150,); w2: (150,7); b2: (7,).
    Returns (B, 7) float32 == sigmoid(x @ w1 + b1) @ w2 + b2."""
    B = x.shape[0]

    # Batch tile: multiple of 128 lanes, capped so double-buffered x/out tiles
    # (8 sublanes x TB lanes x 4 B each) stay far below even v7x's 64 MiB VMEM.
    tile = min(MAX_TILE, _round_up(max(B, 1), 128))
    b_pad = _round_up(B, tile)

    # --- wrapper-side layout plumbing (done once, outside the kernel) ---
    # Batch-on-lanes transpose + zero pad of the batch tail.
    xt = jnp.zeros((IN_DIM, b_pad), jnp.float32).at[:, :B].set(x.T)
    # Hidden dim zero-padded 150 -> 256; weights stored transposed for the
    # lane-dense formulation (h = W1t @ xT, outT = W2t @ h).
    w1t = jnp.zeros((HID_PAD, IN_DIM), jnp.float32).at[:HID_DIM, :].set(w1.T)
    b1p = jnp.zeros((HID_PAD, 1), jnp.float32).at[:HID_DIM, 0].set(b1)
    w2t = jnp.zeros((OUT_DIM, HID_PAD), jnp.float32).at[:, :HID_DIM].set(w2.T)
    b2p = b2.reshape(OUT_DIM, 1)

    grid = (b_pad // tile,)

    out_t = pl.pallas_call(
        _mlp_kernel,
        out_shape=jax.ShapeDtypeStruct((OUT_DIM, b_pad), jnp.float32),
        grid=grid,
        in_specs=[
            pl.BlockSpec((IN_DIM, tile), lambda i: (0, i)),      # x tile, streamed
            pl.BlockSpec((HID_PAD, IN_DIM), lambda i: (0, 0)),   # weights: VMEM-resident
            pl.BlockSpec((HID_PAD, 1), lambda i: (0, 0)),
            pl.BlockSpec((OUT_DIM, HID_PAD), lambda i: (0, 0)),
            pl.BlockSpec((OUT_DIM, 1), lambda i: (0, 0)),
        ],
        out_specs=pl.BlockSpec((OUT_DIM, tile), lambda i: (0, i)),
        compiler_params=pltpu.CompilerParams(
            dimension_semantics=("parallel",),       # shard batch across TCs (v7x)
            vmem_limit_bytes=32 * 1024 * 1024,
        ),
    )(xt, w1t, b1p, w2t, b2p)

    return out_t[:, :B].T


def init_params(key):
    """Deterministic init matching PyTorch nn.Linear default (uniform +-1/sqrt(fan_in)).
    Weights stored as (in, out) so the reference is x @ w + b."""
    k1, k2, k3, k4 = jax.random.split(key, 4)
    bound1 = 1.0 / jnp.sqrt(IN_DIM)
    bound2 = 1.0 / jnp.sqrt(HID_DIM)
    w1 = jax.random.uniform(k1, (IN_DIM, HID_DIM), jnp.float32, -bound1, bound1)
    b1 = jax.random.uniform(k2, (HID_DIM,), jnp.float32, -bound1, bound1)
    w2 = jax.random.uniform(k3, (HID_DIM, OUT_DIM), jnp.float32, -bound2, bound2)
    b2 = jax.random.uniform(k4, (OUT_DIM,), jnp.float32, -bound2, bound2)
    return w1, b1, w2, b2


if __name__ == "__main__":
    key = jax.random.PRNGKey(0)
    pkey, xkey = jax.random.split(key)
    w1, b1, w2, b2 = init_params(pkey)

    B = 8
    x = jax.random.normal(xkey, (B, IN_DIM), jnp.float32)

    out = logistic_model_forward(x, w1, b1, w2, b2)
    out = jax.block_until_ready(out)

    # Reference check in plain JAX (same math as the PyTorch module).
    ref = jax.nn.sigmoid(x @ w1 + b1) @ w2 + b2
    assert out.shape == (B, OUT_DIM)
    assert jnp.allclose(out, ref, atol=1e-5, rtol=1e-5)

    print("KERNEL_OK")
</pallas_src>

<mosaic_0001>
module attributes {stable_mosaic.version = 11 : i64} {
  func.func @_mlp_kernel(%arg0: i32, %arg1: memref<7x128xf32, #tpu.memory_space<vmem>>, %arg2: memref<256x7xf32, #tpu.memory_space<vmem>>, %arg3: memref<256x1xf32, #tpu.memory_space<vmem>>, %arg4: memref<7x256xf32, #tpu.memory_space<vmem>>, %arg5: memref<7x1xf32, #tpu.memory_space<vmem>>, %arg6: memref<7x128xf32, #tpu.memory_space<vmem>>) attributes {dimension_semantics = [#tpu.dimension_semantics<parallel>], iteration_bounds = array<i64: 1>, scalar_prefetch = 0 : i64, scratch_operands = 0 : i64, tpu.core_type = #tpu.core_type<tc>, window_params = [{transform_indices = @transform_0, window_bounds = array<i64: 7, 128>}, {pipeline_mode = #tpu.pipeline_mode<synchronous>, transform_indices = @transform_1, window_bounds = array<i64: 256, 7>}, {pipeline_mode = #tpu.pipeline_mode<synchronous>, transform_indices = @transform_2, window_bounds = array<i64: 256, 1>}, {pipeline_mode = #tpu.pipeline_mode<synchronous>, transform_indices = @transform_3, window_bounds = array<i64: 7, 256>}, {pipeline_mode = #tpu.pipeline_mode<synchronous>, transform_indices = @transform_4, window_bounds = array<i64: 7, 1>}, {transform_indices = @transform_5, window_bounds = array<i64: 7, 128>}]} {
    %c0 = arith.constant 0 : index
    %c0_0 = arith.constant 0 : index
    %0 = vector.load %arg1[%c0, %c0_0] : memref<7x128xf32, #tpu.memory_space<vmem>>, vector<7x128xf32>
    %c0_1 = arith.constant 0 : index
    %c0_2 = arith.constant 0 : index
    %1 = vector.load %arg2[%c0_1, %c0_2] : memref<256x7xf32, #tpu.memory_space<vmem>>, vector<256x7xf32>
    %c0_3 = arith.constant 0 : index
    %c0_4 = arith.constant 0 : index
    %2 = vector.load %arg3[%c0_3, %c0_4] : memref<256x1xf32, #tpu.memory_space<vmem>>, vector<256x1xf32>
    %c0_5 = arith.constant 0 : index
    %c0_6 = arith.constant 0 : index
    %3 = vector.load %arg4[%c0_5, %c0_6] : memref<7x256xf32, #tpu.memory_space<vmem>>, vector<7x256xf32>
    %c0_7 = arith.constant 0 : index
    %c0_8 = arith.constant 0 : index
    %4 = vector.load %arg5[%c0_7, %c0_8] : memref<7x1xf32, #tpu.memory_space<vmem>>, vector<7x1xf32>
    %cst = arith.constant dense<0.000000e+00> : vector<256x128xf32>
    %5 = tpu.matmul %1, %0, %cst {dimension_numbers = #tpu.dot_dimension_numbers<[1], [0], [0], [1], [0, 0, 1, 1], [], []>} : vector<256x7xf32>, vector<7x128xf32>, vector<256x128xf32> -> vector<256x128xf32>
    %6 = vector.broadcast %2 : vector<256x1xf32> to vector<256x128xf32>
    %7 = arith.addf %5, %6 : vector<256x128xf32>
    %8 = arith.negf %7 : vector<256x128xf32>
    %9 = math.exp %8 : vector<256x128xf32>
    %cst_9 = arith.constant 1.000000e+00 : f32
    %10 = vector.broadcast %cst_9 : f32 to vector<256x128xf32>
    %11 = arith.addf %10, %9 : vector<256x128xf32>
    %12 = arith.divf %10, %11 : vector<256x128xf32>
    %cst_10 = arith.constant dense<0.000000e+00> : vector<7x128xf32>
    %13 = tpu.matmul %3, %12, %cst_10 {dimension_numbers = #tpu.dot_dimension_numbers<[1], [0], [0], [1], [0, 0, 1, 1], [], []>} : vector<7x256xf32>, vector<256x128xf32>, vector<7x128xf32> -> vector<7x128xf32>
    %14 = vector.broadcast %4 : vector<7x1xf32> to vector<7x128xf32>
    %15 = arith.addf %13, %14 : vector<7x128xf32>
    %c0_11 = arith.constant 0 : index
    %c0_12 = arith.constant 0 : index
    %16 = vector.load %arg6[%c0_11, %c0_12] : memref<7x128xf32, #tpu.memory_space<vmem>>, vector<7x128xf32>
    tpu.vector_store %arg6[%c0_11, %c0_12], %15 {strides = array<i32>} : memref<7x128xf32, #tpu.memory_space<vmem>>, vector<7x128xf32>,
    return
  }
  func.func @transform_0(%arg0: i32) -> (i32, i32) {
    %c0_i32 = arith.constant 0 : i32
    %c0_i32_0 = arith.constant 0 : i32
    return %c0_i32, %arg0 : i32, i32
  }
  func.func @transform_1(%arg0: i32) -> (i32, i32) {
    %c0_i32 = arith.constant 0 : i32
    %c0_i32_0 = arith.constant 0 : i32
    %c0_i32_1 = arith.constant 0 : i32
    return %c0_i32, %c0_i32_0 : i32, i32
  }
  func.func @transform_2(%arg0: i32) -> (i32, i32) {
    %c0_i32 = arith.constant 0 : i32
    %c0_i32_0 = arith.constant 0 : i32
    %c0_i32_1 = arith.constant 0 : i32
    return %c0_i32, %c0_i32_0 : i32, i32
  }
  func.func @transform_3(%arg0: i32) -> (i32, i32) {
    %c0_i32 = arith.constant 0 : i32
    %c0_i32_0 = arith.constant 0 : i32
    %c0_i32_1 = arith.constant 0 : i32
    return %c0_i32, %c0_i32_0 : i32, i32
  }
  func.func @transform_4(%arg0: i32) -> (i32, i32) {
    %c0_i32 = arith.constant 0 : i32
    %c0_i32_0 = arith.constant 0 : i32
    %c0_i32_1 = arith.constant 0 : i32
    return %c0_i32, %c0_i32_0 : i32, i32
  }
  func.func @transform_5(%arg0: i32) -> (i32, i32) {
    %c0_i32 = arith.constant 0 : i32
    %c0_i32_0 = arith.constant 0 : i32
    return %c0_i32, %arg0 : i32, i32
  }
}

</mosaic_0001>

<bundles_post_ra>
// kernel: tpu_custom_call.1
= control target key start
LH: loop header
LB: loop body
LE: loop exit
PB: predicated region body
PF: predicated region fallthrough
CT: control target
= control target key end

     0   :  { %vm346_vm0 = vcmask 1046528   ;;  %vm249_vm1 = vcmask 56320   ;;  %v1228_v4 = vmov 0   ;;  %s1628_s0 = inlined_call_operand.vmem [shape: f32[7,128], index: 0, kind: input, shape index: {}]   ;;  %s1629_s1 = inlined_call_operand.vmem [shape: f32[256,7], index: 1, kind: input, shape index: {}]   ;;  %s1630_s2 = inlined_call_operand.vmem [shape: f32[256,1], index: 2, kind: input, shape index: {}]   ;;  %s1631_s3 = inlined_call_operand.vmem [shape: f32[7,256], index: 3, kind: input, shape index: {}]   ;;  %s1632_s4 = inlined_call_operand.vmem [shape: f32[7,1], index: 4, kind: input, shape index: {}]   ;;  %s1633_s5 = inlined_call_operand.hbm [shape: f32[7,128], index: 5, kind: output, shape index: {}]  }
   0x1   :  { %v21_v0 = vld [vmem:[%s1628_s0] sm:$0x7f]  ;;  %v23_v2 = vld [vmem:[%s1629_s1 + $0x8] sm:$0xff]  ;;  %v24_v3 = vld [vmem:[%s1629_s1 + $0x10] sm:$0xff]  ;;  %1074 = vset.pattern.permute.xlu0 %v1228_v4  ;;  %1075 = vset.pattern.permute.xlu1 %v1228_v4 }
   0x2   :  { %v22_v1 = vld [vmem:[%s1629_s1] sm:$0xff]  ;;  %990 = vmatprep.subr.msk.mxu0 %vm346_vm0, %v21_v0  ;;  %v25_v5 = vld [vmem:[%s1629_s1 + $0x18] sm:$0xff]  ;;  %v71_v9 = vld [vmem:[%s1630_s2 + $0x88] sm:$0xff] }
   0x3   :  { %992 = vmatprep.mubr.msk.f32.mxu0 %vm249_vm1, %v22_v1  ;;  %991 = vmatpush3.msk.msra.mxu0 %vm346_vm0, %v21_v0  ;;  %v70_v6 = vld [vmem:[%s1630_s2 + $0x80] sm:$0xff]  ;;  %v55_v10 = vld [vmem:[%s1630_s2 + $0x8] sm:$0xff]  ;;  %v28_v12 = vld [vmem:[%s1629_s1 + $0x30] sm:$0xff] }
   0x4   :  { %993 = vmatmul.mubr.msk.f32.vlgmr.msra.gmra.mrb[0].mxu0 %vm249_vm1, %v23_v2  ;;  %v26_v7 = vld [vmem:[%s1629_s1 + $0x20] sm:$0xff]  ;;  %171 = vperm.xlu0 %1074, %v70_v6   ;;  %v27_v11 = vld [vmem:[%s1629_s1 + $0x28] sm:$0xff]  ;;  %v72_v13 = vld [vmem:[%s1630_s2 + $0x90] sm:$0xff] }
   0x5   :  { %995 = vmatprep.mubr.msk.f32.mxu0 %vm249_vm1, %v24_v3  ;;  %v54_v8 = vld [vmem:[%s1630_s2] sm:$0xff]  ;;  %v73_v14 = vld [vmem:[%s1630_s2 + $0x98] sm:$0xff]  ;;  %v56_v17 = vld [vmem:[%s1630_s2 + $0x10] sm:$0xff] }
   0x6   :  { %91 = vperm.xlu1 %1075, %v54_v8   ;;  %v29_v15 = vld [vmem:[%s1629_s1 + $0x38] sm:$0xff]  ;;  %v30_v16 = vld [vmem:[%s1629_s1 + $0x40] sm:$0xff]  ;;  %v31_v19 = vld [vmem:[%s1629_s1 + $0x48] sm:$0xff] }
   0x7   :  { %v57_v18 = vld [vmem:[%s1630_s2 + $0x18] sm:$0xff]  ;;  %v32_v20 = vld [vmem:[%s1629_s1 + $0x50] sm:$0xff]  ;;  %v74_v21 = vld [vmem:[%s1630_s2 + $0xa0] sm:$0xff] }
   0x8   :  { %996 = vmatmul.mubr.msk.f32.gmra.mrb[2].mxu0 %vm249_vm1, %v25_v5  ;;  %176 = vperm.xlu0 %1074, %v71_v9   ;;  %v75_v22 = vld [vmem:[%s1630_s2 + $0xa8] sm:$0xff]  ;;  %v33_v23 = vld [vmem:[%s1629_s1 + $0x58] sm:$0xff]  ;;  %v34_v24 = vld [vmem:[%s1629_s1 + $0x60] sm:$0xff] }
   0x9   :  { %998 = vmatprep.mubr.msk.f32.mxu0 %vm249_vm1, %v26_v7  ;;  %v58_v25 = vld [vmem:[%s1630_s2 + $0x20] sm:$0xff] }
   0xa   :  { %96 = vperm.xlu1 %1075, %v55_v10  }
   0xc   :  { %999 = vmatmul.mubr.msk.f32.gmra.mrb[4].mxu0 %vm249_vm1, %v27_v11  ;;  %181 = vperm.xlu0 %1074, %v72_v13  }
   0xd   :  { %1001 = vmatprep.mubr.msk.f32.mxu0 %vm249_vm1, %v28_v12 }
   0xe   :  { %186 = vperm.xlu1 %1075, %v73_v14  }
  0x10   :  { %1002 = vmatmul.mubr.msk.f32.gmra.mrb[6].mxu0 %vm249_vm1, %v29_v15  ;;  %101 = vperm.xlu0 %1074, %v56_v17  }
  0x11   :  { %1004 = vmatprep.mubr.msk.f32.mxu0 %vm249_vm1, %v30_v16 }
  0x12   :  { %106 = vperm.xlu1 %1075, %v57_v18  }
  0x14   :  { %1005 = vmatmul.mubr.msk.f32.gmra.mrb[8].mxu0 %vm249_vm1, %v31_v19  ;;  %191 = vperm.xlu0 %1074, %v74_v21  }
  0x15   :  { %1007 = vmatprep.mubr.msk.f32.mxu0 %vm249_vm1, %v32_v20 }
  0x16   :  { %196 = vperm.xlu1 %1075, %v75_v22  }
  0x17   :  { %10 = vsyncpa [#allocation3], 0  ;;  %v59_v26 = vld [vmem:[%s1630_s2 + $0x28] sm:$0xff]  ;;  %v36_v28 = vld [vmem:[%s1629_s1 + $0x70] sm:$0xff]  ;;  %s1229_s21 = smov [#allocation2]  }
  0x18   :  { %1008 = vmatmul.mubr.msk.f32.gmra.mrb[10].mxu0 %vm249_vm1, %v33_v23  ;;  %v35_v27 = vld [vmem:[%s1629_s1 + $0x68] sm:$0xff]  ;;  %111 = vperm.xlu0 %1074, %v58_v25   ;;  %v76_v29 = vld [vmem:[%s1630_s2 + $0xb0] sm:$0xff]  ;;  %v77_v30 = vld [vmem:[%s1630_s2 + $0xb8] sm:$0xff]  ;;  %s849_s22 = sshll.u32 %s1229_s21, 4  ;;  %s850_s22 = int_to_ptr.vmem [resolvable:$true] %s849_s22 }
  0x19   :  { %1010 = vmatprep.mubr.msk.f32.mxu0 %vm249_vm1, %v34_v24  ;;  %v37_v31 = vld [vmem:[%s1629_s1 + $0x78] sm:$0xff]  ;;  %v38_v32 = vld [vmem:[%s1629_s1 + $0x80] sm:$0xff]  ;;  %v60_v33 = vld [vmem:[%s1630_s2 + $0x30] sm:$0xff]  ;;  %s1204_s23 = scalar_lea.vmem %s850_s22, 128  ;;  %p1209_p1 = scmp.lt.s32.totalorder %s850_s22, %s850_s22 }
  0x1a   :  { %116 = vperm.xlu1 %1075, %v59_v26   ;;  %v61_v34 = vld [vmem:[%s1630_s2 + $0x38] sm:$0xff]  ;;  %v39_v35 = vld [vmem:[%s1629_s1 + $0x88] sm:$0xff]  ;;  %v40_v36 = vld [vmem:[%s1629_s1 + $0x90] sm:$0xff]  ;;  %p1205_p0 = scmp.ne.s32.totalorder %s850_s22, %s1204_s23  ;;  %p1210_p2 = scmp.lt.s32.totalorder %s1204_s23, %s1204_s23 }
  0x1b   :  { %v78_v37 = vld [vmem:[%s1630_s2 + $0xc0] sm:$0xff]  ;;  %v79_v38 = vld [vmem:[%s1630_s2 + $0xc8] sm:$0xff]  ;;  %v41_v39 = vld [vmem:[%s1629_s1 + $0x98] sm:$0xff] }
  0x1c   :  { %1011 = vmatmul.mubr.msk.f32.gmra.mrb[12].mxu0 %vm249_vm1, %v35_v27  ;;  %201 = vperm.xlu0 %1074, %v76_v29   ;;  %v42_v40 = vld [vmem:[%s1629_s1 + $0xa0] sm:$0xff]  ;;  %v63_v42 = vld [vmem:[%s1630_s2 + $0x48] sm:$0xff]  ;;  %v44_v44 = vld [vmem:[%s1629_s1 + $0xb0] sm:$0xff]  ;;  %p1211_p3 = por %p1210_p2, %p1209_p1 }
  0x1d   :  { %1013 = vmatprep.mubr.msk.f32.mxu0 %vm249_vm1, %v36_v28  ;;  %v62_v41 = vld [vmem:[%s1630_s2 + $0x40] sm:$0xff]  ;;  %v43_v43 = vld [vmem:[%s1629_s1 + $0xa8] sm:$0xff]  ;;  %v80_v45 = vld [vmem:[%s1630_s2 + $0xd0] sm:$0xff] }
  0x1e   :  { %206 = vperm.xlu1 %1075, %v77_v30   ;;  %v81_v46 = vld [vmem:[%s1630_s2 + $0xd8] sm:$0xff]  ;;  %v46_v48 = vld [vmem:[%s1629_s1 + $0xc0] sm:$0xff]  ;;  %v64_v49 = vld [vmem:[%s1630_s2 + $0x50] sm:$0xff]  ;;  %p1212_p4 = pnand %p1211_p3, %p1205_p0 }
  0x1f   :  { %v45_v47 = vld [vmem:[%s1629_s1 + $0xb8] sm:$0xff]  ;;  %v47_v51 = vld [vmem:[%s1629_s1 + $0xc8] sm:$0xff]  ;;  %v48_v52 = vld [vmem:[%s1629_s1 + $0xd0] sm:$0xff] }
  0x20   :  { %1014 = vmatmul.mubr.msk.f32.gmra.mrb[14].mxu0 %vm249_vm1, %v37_v31  ;;  %121 = vperm.xlu0 %1074, %v60_v33   ;;  %v65_v50 = vld [vmem:[%s1630_s2 + $0x58] sm:$0xff]  ;;  %v82_v53 = vld [vmem:[%s1630_s2 + $0xe0] sm:$0xff]  ;;  %v83_v54 = vld [vmem:[%s1630_s2 + $0xe8] sm:$0xff] }
  0x21   :  { %1016 = vmatprep.mubr.msk.f32.mxu0 %vm249_vm1, %v38_v32  ;;  %v49_v55 = vld [vmem:[%s1629_s1 + $0xd8] sm:$0xff]  ;;  %v50_v56 = vld [vmem:[%s1629_s1 + $0xe0] sm:$0xff]  ;;  %v67_v58 = vld [vmem:[%s1630_s2 + $0x68] sm:$0xff] }
  0x22   :  { %126 = vperm.xlu1 %1075, %v61_v34   ;;  %v66_v57 = vld [vmem:[%s1630_s2 + $0x60] sm:$0xff]  ;;  %v51_v59 = vld [vmem:[%s1629_s1 + $0xe8] sm:$0xff]  ;;  %v52_v60 = vld [vmem:[%s1629_s1 + $0xf0] sm:$0xff] }
  0x23   :  { %v84_v61 = vld [vmem:[%s1630_s2 + $0xf0] sm:$0xff]  ;;  %v85_v62 = vld [vmem:[%s1630_s2 + $0xf8] sm:$0xff]  ;;  %v88_v2 = vld [vmem:[%s1632_s4] sm:$0x7f] }
  0x24   :  { %1017 = vmatmul.mubr.msk.f32.gmra.mrb[16].mxu0 %vm249_vm1, %v39_v35  ;;  %211 = vperm.xlu0 %1074, %v78_v37   ;;  %v53_v63 = vld [vmem:[%s1629_s1 + $0xf8] sm:$0xff]  ;;  %v68_v0 = vld [vmem:[%s1630_s2 + $0x70] sm:$0xff]  ;;  %v87_v14 = vld [vmem:[%s1631_s3 + $0x8] sm:$0x7f] }
  0x25   :  { %1019 = vmatprep.mubr.msk.f32.mxu0 %vm249_vm1, %v40_v36  ;;  %v69_v1 = vld [vmem:[%s1630_s2 + $0x78] sm:$0xff]  ;;  %836 = vmatprep.mubr.f32.mxu1 %v87_v14 }
  0x26   :  { %216 = vperm.xlu1 %1075, %v79_v38  }
  0x28   :  { %1020 = vmatmul.mubr.msk.f32.gmra.mrb[18].mxu0 %vm249_vm1, %v41_v39  ;;  %131 = vperm.xlu0 %1074, %v62_v41  }
  0x29   :  { %1022 = vmatprep.mubr.msk.f32.mxu0 %vm249_vm1, %v42_v40 }
  0x2a   :  { %136 = vperm.xlu1 %1075, %v63_v42  }
  0x2c   :  { %1023 = vmatmul.mubr.msk.f32.gmra.mrb[20].mxu0 %vm249_vm1, %v43_v43  ;;  %221 = vperm.xlu0 %1074, %v80_v45  }
  0x2d   :  { %1025 = vmatprep.mubr.msk.f32.mxu0 %vm249_vm1, %v44_v44 }
  0x2e   :  { %226 = vperm.xlu1 %1075, %v81_v46  }
  0x30   :  { %1026 = vmatmul.mubr.msk.f32.gmra.mrb[22].mxu0 %vm249_vm1, %v45_v47  ;;  %141 = vperm.xlu0 %1074, %v64_v49  }
  0x31   :  { %1028 = vmatprep.mubr.msk.f32.mxu0 %vm249_vm1, %v46_v48 }
  0x32   :  { %146 = vperm.xlu1 %1075, %v65_v50  }
  0x34   :  { %1029 = vmatmul.mubr.msk.f32.gmra.mrb[24].mxu0 %vm249_vm1, %v47_v51  ;;  %231 = vperm.xlu0 %1074, %v82_v53  }
  0x35   :  { %1031 = vmatprep.mubr.msk.f32.mxu0 %vm249_vm1, %v48_v52 }
  0x36   :  { %236 = vperm.xlu1 %1075, %v83_v54  }
  0x38   :  { %1032 = vmatmul.mubr.msk.f32.gmra.mrb[26].mxu0 %vm249_vm1, %v49_v55  ;;  %151 = vperm.xlu0 %1074, %v66_v57  }
  0x39   :  { %1034 = vmatprep.mubr.msk.f32.mxu0 %vm249_vm1, %v50_v56 }
  0x3a   :  { %156 = vperm.xlu1 %1075, %v67_v58  }
  0x3c   :  { %1035 = vmatmul.mubr.msk.f32.gmra.mrb[28].mxu0 %vm249_vm1, %v51_v59  ;;  %241 = vperm.xlu0 %1074, %v84_v61  }
  0x3d   :  { %1037 = vmatprep.mubr.msk.f32.mxu0 %vm249_vm1, %v52_v60 }
  0x3e   :  { %246 = vperm.xlu1 %1075, %v85_v62  }
  0x40   :  { %1038 = vmatmul.mubr.msk.f32.gmra.mrb[30].mxu0 %vm249_vm1, %v53_v63  ;;  %161 = vperm.xlu0 %1074, %v68_v0  }
  0x42   :  { %166 = vperm.xlu1 %1075, %v69_v1  }
  0x44   :  { %769 = vperm.xlu0 %1074, %v88_v2  }
  0x83   :  { %v1490_v4 = vpop.permute.xlu0 %171 }
  0x85   :  { %v92_v3 = vpop.permute.xlu1 %91 }
  0x87   :  { %v1492_v6 = vpop.permute.xlu0 %176 }
  0x89   :  { %v97_v5 = vpop.permute.xlu1 %96 }
  0x8b   :  { %v1496_v8 = vpop.permute.xlu0 %181 }
  0x8d   :  { %v1494_v7 = vpop.permute.xlu1 %186 }
  0x8f   :  { %v102_v10 = vpop.permute.xlu0 %101 }
  0x91   :  { %v107_v9 = vpop.permute.xlu1 %106 }
  0x93   :  { %v1500_v12 = vpop.permute.xlu0 %191 }
  0x95   :  { %v1498_v11 = vpop.permute.xlu1 %196 }
  0x97   :  { %v112_v15 = vpop.permute.xlu0 %111 }
  0x99   :  { %v117_v13 = vpop.permute.xlu1 %116 }
  0x9b   :  { %v1507_v17 = vpop.permute.xlu0 %201 }
  0x9d   :  { %v1505_v16 = vpop.permute.xlu1 %206 }
  0x9f   :  { %v122_v19 = vpop.permute.xlu0 %121 }
  0xa1   :  { %v127_v18 = vpop.permute.xlu1 %126 }
  0xa3   :  { %v1511_v21 = vpop.permute.xlu0 %211 }
  0xa5   :  { %v1509_v20 = vpop.permute.xlu1 %216 }
  0xa7   :  { %v132_v23 = vpop.permute.xlu0 %131 }
  0xa9   :  { %v137_v22 = vpop.permute.xlu1 %136 }
  0xab   :  { %v1515_v25 = vpop.permute.xlu0 %221 }
  0xad   :  { %v1513_v24 = vpop.permute.xlu1 %226 }
  0xaf   :  { %v142_v34 = vpop.permute.xlu0 %141 }
  0xb1   :  { %v147_v31 = vpop.permute.xlu1 %146 }
  0xb3   :  { %v1519_v45 = vpop.permute.xlu0 %231 }
  0xb5   :  { %v1517_v43 = vpop.permute.xlu1 %236 }
  0xb7   :  { %v152_v59 = vpop.permute.xlu0 %151 }
  0xb9   :  { %v157_v55 = vpop.permute.xlu1 %156 }
  0xd7   :  { %v994_v26 = vpop.f32.mrb[0].mxu0 }
  0xd8   :  { %v422_v27 = vadd.f32 %v994_v26, %v97_v5  ;;  %v416_v28 = vpop.f32.mrb[1].mxu0 }
  0xd9   :  { %v417_v29 = vadd.f32 %v416_v28, %v92_v3 }
  0xda   :  { %v891_v30 = vmul.f32 -1.442695, %v422_v27 }
  0xdb   :  { %v890_v32 = vmul.f32 -1.442695, %v417_v29  ;;  %v997_v33 = vpop.f32.mrb[2].mxu0 }
  0xdc   :  { %1076 = vpow2.f32 %v891_v30  ;;  %v432_v35 = vadd.f32 %v997_v33, %v107_v9  ;;  %v426_v36 = vpop.f32.mrb[3].mxu0 }
  0xdd   :  { %1078 = vpow2.f32 %v890_v32  ;;  %v427_v37 = vadd.f32 %v426_v36, %v102_v10 }
  0xde   :  { %v893_v38 = vmul.f32 -1.442695, %v432_v35 }
  0xdf   :  { %v892_v39 = vmul.f32 -1.442695, %v427_v37  ;;  %v1000_v40 = vpop.f32.mrb[4].mxu0 }
  0xe0   :  { %1080 = vpow2.f32 %v893_v38  ;;  %v442_v41 = vadd.f32 %v1000_v40, %v117_v13  ;;  %v436_v42 = vpop.f32.mrb[5].mxu0 }
  0xe1   :  { %1082 = vpow2.f32 %v892_v39  ;;  %v437_v44 = vadd.f32 %v436_v42, %v112_v15  ;;  %v1521_v15 = vpop.permute.xlu1 %246 }
  0xe2   :  { %v895_v46 = vmul.f32 -1.442695, %v442_v41 }
  0xe3   :  { %v894_v47 = vmul.f32 -1.442695, %v437_v44  ;;  %v1003_v48 = vpop.f32.mrb[6].mxu0 }
  0xe4   :  { %1084 = vpow2.f32 %v895_v46  ;;  %v452_v49 = vadd.f32 %v1003_v48, %v127_v18  ;;  %v446_v50 = vpop.f32.mrb[7].mxu0 }
  0xe5   :  { %1086 = vpow2.f32 %v894_v47  ;;  %v447_v51 = vadd.f32 %v446_v50, %v122_v19  ;;  %v167_v37 = vpop.permute.xlu1 %166 }
  0xe6   :  { %v1077_v52 = vpop.eup %1076  ;;  %v897_v53 = vmul.f32 -1.442695, %v452_v49 }
  0xe7   :  { %v1079_v54 = vpop.eup %1078  ;;  %v672_v56 = vadd.f32 1.0, %v1077_v52  ;;  %v896_v57 = vmul.f32 -1.442695, %v447_v51  ;;  %v1006_v58 = vpop.f32.mrb[8].mxu0 }
  0xe8   :  { %v671_v60 = vadd.f32 1.0, %v1079_v54  ;;  %1088 = vpow2.f32 %v897_v53  ;;  %v462_v61 = vadd.f32 %v1006_v58, %v137_v22  ;;  %v456_v62 = vpop.f32.mrb[9].mxu0  ;;  %v1523_v22 = vpop.permute.xlu0 %241 }
  0xe9   :  { %1090 = vrcp.f32 %v672_v56  ;;  %v457_v63 = vadd.f32 %v456_v62, %v132_v23 }
  0xea   :  { %v1081_v0 = vpop.eup %1080  ;;  %1092 = vrcp.f32 %v671_v60  ;;  %v899_v1 = vmul.f32 -1.442695, %v462_v61 }
  0xeb   :  { %v1083_v2 = vpop.eup %1082  ;;  %v674_v3 = vadd.f32 1.0, %v1081_v0  ;;  %1094 = vpow2.f32 %v896_v57  ;;  %v898_v5 = vmul.f32 -1.442695, %v457_v63  ;;  %v1009_v9 = vpop.f32.mrb[10].mxu0 }
  0xec   :  { %v673_v10 = vadd.f32 1.0, %v1083_v2  ;;  %1096 = vpow2.f32 %v899_v1  ;;  %v472_v13 = vadd.f32 %v1009_v9, %v147_v31  ;;  %v466_v14 = vpop.f32.mrb[11].mxu0  ;;  %v162_v42 = vpop.permute.xlu0 %161 }
  0xed   :  { %1098 = vrcp.f32 %v674_v3  ;;  %v467_v18 = vadd.f32 %v466_v14, %v142_v34 }
  0xee   :  { %v1085_v19 = vpop.eup %1084  ;;  %1100 = vrcp.f32 %v673_v10  ;;  %v901_v23 = vmul.f32 -1.442695, %v472_v13 }
  0xef   :  { %v1087_v26 = vpop.eup %1086  ;;  %v676_v27 = vadd.f32 1.0, %v1085_v19  ;;  %1102 = vpow2.f32 %v898_v5  ;;  %v900_v28 = vmul.f32 -1.442695, %v467_v18  ;;  %v1012_v29 = vpop.f32.mrb[12].mxu0 }
  0xf0   :  { %v675_v30 = vadd.f32 1.0, %v1087_v26  ;;  %1104 = vpow2.f32 %v901_v23  ;;  %v482_v32 = vadd.f32 %v1012_v29, %v157_v55  ;;  %v476_v33 = vpop.f32.mrb[13].mxu0 }
  0xf1   :  { %1106 = vrcp.f32 %v676_v27  ;;  %v477_v31 = vadd.f32 %v476_v33, %v152_v59 }
  0xf2   :  { %v1089_v35 = vpop.eup %1088  ;;  %1108 = vrcp.f32 %v675_v30  ;;  %v903_v36 = vmul.f32 -1.442695, %v482_v32 }
  0xf3   :  { %v1525_v34 = vpop.eup %1090  ;;  %v678_v38 = vadd.f32 1.0, %v1089_v35  ;;  %1110 = vpow2.f32 %v900_v28  ;;  %v902_v39 = vmul.f32 -1.442695, %v477_v31  ;;  %v1015_v40 = vpop.f32.mrb[14].mxu0 }
  0xf4   :  { %v1527_v41 = vpop.eup %1092  ;;  %1112 = vpow2.f32 %v903_v36  ;;  %v492_v44 = vadd.f32 %v1015_v40, %v167_v37  ;;  %v486_v46 = vpop.f32.mrb[15].mxu0 }
  0xf5   :  { %v1095_v47 = vpop.eup %1094  ;;  %1114 = vrcp.f32 %v678_v38  ;;  %v487_v48 = vadd.f32 %v486_v46, %v162_v42  ;;  %v1042_v49 = vpack.c.bf16 %v1525_v34, %v1527_v41 }
  0xf6   :  { %v1097_v50 = vpop.eup %1096  ;;  %v677_v51 = vadd.f32 1.0, %v1095_v47  ;;  %1116 = vpow2.f32 %v902_v39  ;;  %v905_v52 = vmul.f32 -1.442695, %v492_v44 }
  0xf7   :  { %v1531_v53 = vpop.eup %1098  ;;  %v680_v54 = vadd.f32 1.0, %v1097_v50  ;;  %v904_v55 = vmul.f32 -1.442695, %v487_v48  ;;  %v1018_v56 = vpop.f32.mrb[16].mxu0 }
  0xf8   :  { %v1533_v57 = vpop.eup %1100  ;;  %1118 = vrcp.f32 %v677_v51  ;;  %v502_v58 = vadd.f32 %v1018_v56, %v1492_v6  ;;  %v496_v59 = vpop.f32.mrb[17].mxu0 }
  0xf9   :  { %v1103_v60 = vpop.eup %1102  ;;  %1120 = vrcp.f32 %v680_v54  ;;  %v497_v61 = vadd.f32 %v496_v59, %v1490_v4  ;;  %v1046_v62 = vpack.c.bf16 %v1531_v53, %v1533_v57 }
  0xfa   :  { %v1105_v63 = vpop.eup %1104  ;;  %v679_v0 = vadd.f32 1.0, %v1103_v60  ;;  %1122 = vpow2.f32 %v905_v52  ;;  %v907_v1 = vmul.f32 -1.442695, %v502_v58 }
  0xfb   :  { %v1539_v2 = vpop.eup %1106  ;;  %v682_v3 = vadd.f32 1.0, %v1105_v63  ;;  %1124 = vpow2.f32 %v904_v55  ;;  %v906_v5 = vmul.f32 -1.442695, %v497_v61  ;;  %v1021_v9 = vpop.f32.mrb[18].mxu0 }
  0xfc   :  { %v1541_v10 = vpop.eup %1108  ;;  %1126 = vrcp.f32 %v679_v0  ;;  %v512_v6 = vadd.f32 %v1021_v9, %v1494_v7  ;;  %v506_v13 = vpop.f32.mrb[19].mxu0 }
  0xfd   :  { %v1111_v4 = vpop.eup %1110  ;;  %1128 = vrcp.f32 %v682_v3  ;;  %v507_v14 = vadd.f32 %v506_v13, %v1496_v8  ;;  %v1050_v18 = vpack.c.bf16 %v1539_v2, %v1541_v10 }
  0xfe   :  { %v1113_v19 = vpop.eup %1112  ;;  %v681_v23 = vadd.f32 1.0, %v1111_v4  ;;  %1130 = vpow2.f32 %v907_v1  ;;  %v909_v26 = vmul.f32 -1.442695, %v512_v6 }
  0xff   :  { %v1547_v27 = vpop.eup %1114  ;;  %v684_v28 = vadd.f32 1.0, %v1113_v19  ;;  %1132 = vpow2.f32 %v906_v5  ;;  %v1024_v29 = vpop.f32.mrb[20].mxu0  ;;  %v908_v7 = vmul.f32 -1.442695, %v507_v14 }
 0x100   :  { %v1117_v30 = vpop.eup %1116  ;;  %1134 = vrcp.f32 %v681_v23  ;;  %v522_v32 = vadd.f32 %v1024_v29, %v1498_v11  ;;  %v516_v33 = vpop.f32.mrb[21].mxu0 }
 0x101   :  { %1136 = vrcp.f32 %v684_v28  ;;  %v683_v8 = vadd.f32 1.0, %v1117_v30  ;;  %v517_v31 = vadd.f32 %v516_v33, %v1500_v12 }
 0x102   :  { %v1551_v35 = vpop.eup %1118  ;;  %1138 = vpow2.f32 %v909_v26  ;;  %v911_v36 = vmul.f32 -1.442695, %v522_v32 }
 0x103   :  { %v1553_v37 = vpop.eup %1120  ;;  %1140 = vrcp.f32 %v683_v8  ;;  %v910_v38 = vmul.f32 -1.442695, %v517_v31  ;;  %v1027_v39 = vpop.f32.mrb[22].mxu0  ;;  %v1054_v40 = vpack.c.bf16 %v1547_v27, %v1551_v35 }
 0x104   :  { %v1123_v42 = vpop.eup %1122  ;;  %1142 = vpow2.f32 %v908_v7  ;;  %v532_v11 = vadd.f32 %v1027_v39, %v1505_v16  ;;  %v526_v44 = vpop.f32.mrb[23].mxu0 }
 0x105   :  { %v1125_v46 = vpop.eup %1124  ;;  %v686_v47 = vadd.f32 1.0, %v1123_v42  ;;  %1144 = vpow2.f32 %v911_v36  ;;  %v527_v12 = vadd.f32 %v526_v44, %v1507_v17 }
 0x106   :  { %v1559_v48 = vpop.eup %1126  ;;  %v685_v50 = vadd.f32 1.0, %v1125_v46  ;;  %1146 = vpow2.f32 %v910_v38  ;;  %v913_v51 = vmul.f32 -1.442695, %v532_v11 }
 0x107   :  { %v1561_v52 = vpop.eup %1128  ;;  %1148 = vrcp.f32 %v686_v47  ;;  %v912_v54 = vmul.f32 -1.442695, %v527_v12  ;;  %v1030_v55 = vpop.f32.mrb[24].mxu0  ;;  %v1058_v56 = vpack.c.bf16 %v1553_v37, %v1559_v48  ;;  %v86_v37 = vld [vmem:[%s1631_s3] sm:$0x7f] }
 0x108   :  { %v1131_v16 = vpop.eup %1130  ;;  %1150 = vrcp.f32 %v685_v50  ;;  %v542_v58 = vadd.f32 %v1030_v55, %v1509_v20  ;;  %v536_v59 = vpop.f32.mrb[25].mxu0 }
 0x109   :  { %v1133_v60 = vpop.eup %1132  ;;  %v688_v17 = vadd.f32 1.0, %v1131_v16  ;;  %1152 = vpow2.f32 %v913_v51  ;;  %v537_v61 = vadd.f32 %v536_v59, %v1511_v21 }
 0x10a   :  { %v1567_v63 = vpop.eup %1134  ;;  %v687_v0 = vadd.f32 1.0, %v1133_v60  ;;  %1154 = vpow2.f32 %v912_v54  ;;  %v915_v1 = vmul.f32 -1.442695, %v542_v58 }
 0x10b   :  { %v1569_v3 = vpop.eup %1136  ;;  %1156 = vrcp.f32 %v688_v17  ;;  %v914_v5 = vmul.f32 -1.442695, %v537_v61  ;;  %v1033_v9 = vpop.f32.mrb[26].mxu0  ;;  %v1062_v6 = vpack.c.bf16 %v1561_v52, %v1567_v63 }
 0x10c   :  { %v1139_v20 = vpop.eup %1138  ;;  %1158 = vrcp.f32 %v687_v0  ;;  %v552_v13 = vadd.f32 %v1033_v9, %v1513_v24  ;;  %v546_v4 = vpop.f32.mrb[27].mxu0 }
 0x10d   :  { %v1574_v14 = vpop.eup %1140  ;;  %v690_v21 = vadd.f32 1.0, %v1139_v20  ;;  %1160 = vpow2.f32 %v915_v1  ;;  %v547_v19 = vadd.f32 %v546_v4, %v1515_v25 }
 0x10e   :  { %v1143_v23 = vpop.eup %1142  ;;  %1162 = vpow2.f32 %v914_v5  ;;  %v917_v26 = vmul.f32 -1.442695, %v552_v13  ;;  %v1066_v28 = vpack.c.bf16 %v1569_v3, %v1574_v14 }
 0x10f   :  { %v1145_v29 = vpop.eup %1144  ;;  %1164 = vrcp.f32 %v690_v21  ;;  %v689_v30 = vadd.f32 1.0, %v1143_v23  ;;  %v1036_v7 = vpop.f32.mrb[28].mxu0  ;;  %v916_v24 = vmul.f32 -1.442695, %v547_v19 }
 0x110   :  { %v1147_v32 = vpop.eup %1146  ;;  %v692_v33 = vadd.f32 1.0, %v1145_v29  ;;  %1166 = vpow2.f32 %v917_v26  ;;  %v562_v8 = vadd.f32 %v1036_v7, %v1517_v43  ;;  %v556_v31 = vpop.f32.mrb[29].mxu0 }
 0x111   :  { %v1580_v36 = vpop.eup %1148  ;;  %1168 = vrcp.f32 %v689_v30  ;;  %v691_v25 = vadd.f32 1.0, %v1147_v32  ;;  %v557_v38 = vadd.f32 %v556_v31, %v1519_v45 }
 0x112   :  { %v1583_v39 = vpop.eup %1150  ;;  %1170 = vrcp.f32 %v692_v33  ;;  %v919_v42 = vmul.f32 -1.442695, %v562_v8 }
 0x113   :  { %v1153_v11 = vpop.eup %1152  ;;  %1172 = vrcp.f32 %v691_v25  ;;  %v1039_v44 = vpop.f32.mrb[30].mxu0  ;;  %v1070_v46 = vpack.c.bf16 %v1580_v36, %v1583_v39  ;;  %v918_v43 = vmul.f32 -1.442695, %v557_v38 }
 0x114   :  { %v1155_v47 = vpop.eup %1154  ;;  %v694_v12 = vadd.f32 1.0, %v1153_v11  ;;  %1174 = vpow2.f32 %v916_v24  ;;  %v572_v50 = vadd.f32 %v1039_v44, %v1521_v15  ;;  %v566_v51 = vpop.f32.mrb[31].mxu0 }
 0x115   :  { %v1157_v54 = vpop.eup %1156  ;;  %v693_v55 = vadd.f32 1.0, %v1155_v47  ;;  %1176 = vpow2.f32 %v919_v42  ;;  %v567_v45 = vadd.f32 %v566_v51, %v1523_v22 }
 0x116   :  { %v1159_v16 = vpop.eup %1158  ;;  %1178 = vrcp.f32 %v694_v12  ;;  %v921_v58 = vmul.f32 -1.442695, %v572_v50 }
 0x117   :  { %v1161_v59 = vpop.eup %1160  ;;  %1180 = vrcp.f32 %v693_v55  ;;  %v1040_v60 = vpack.c.bf16 %v1157_v54, %v1159_v16  ;;  %v920_v0 = vmul.f32 -1.442695, %v567_v45 }
 0x118   :  { %v1163_v17 = vpop.eup %1162  ;;  %v696_v61 = vadd.f32 1.0, %v1161_v59  ;;  %1182 = vpow2.f32 %v918_v43 }
 0x119   :  { %v1165_v1 = vpop.eup %1164  ;;  %v695_v5 = vadd.f32 1.0, %v1163_v17  ;;  %1184 = vpow2.f32 %v921_v58  ;;  %1041 = vmatprep.subr.bf16.mxu1 %v1040_v60 }
 0x11a   :  { %v1167_v15 = vpop.eup %1166  ;;  %1186 = vrcp.f32 %v696_v61  ;;  %1043 = vmatpush3.bf16.msra.mxu1 %v1042_v49 }
 0x11b   :  { %v1169_v22 = vpop.eup %1168  ;;  %1188 = vrcp.f32 %v695_v5  ;;  %v698_v9 = vadd.f32 1.0, %v1167_v15 }
 0x11c   :  { %v1171_v20 = vpop.eup %1170  ;;  %1190 = vpow2.f32 %v920_v0  ;;  %v1044_v13 = vpack.c.bf16 %v1165_v1, %v1169_v22 }
 0x11d   :  { %v1173_v4 = vpop.eup %1172  ;;  %1192 = vrcp.f32 %v698_v9 }
 0x11e   :  { %v1175_v21 = vpop.eup %1174  ;;  %1045 = vmatprep.subr.bf16.mxu1 %v1044_v13  ;;  %v1048_v19 = vpack.c.bf16 %v1171_v20, %v1173_v4 }
 0x11f   :  { %v1177_v23 = vpop.eup %1176  ;;  %v697_v26 = vadd.f32 1.0, %v1175_v21  ;;  %1047 = vmatpush3.bf16.msra.mxu1 %v1046_v62 }
 0x120   :  { %v1179_v29 = vpop.eup %1178  ;;  %v700_v34 = vadd.f32 1.0, %v1177_v23  ;;  %1049 = vmatprep.subr.bf16.mxu1 %v1048_v19 }
 0x121   :  { %v1181_v41 = vpop.eup %1180  ;;  %1194 = vrcp.f32 %v697_v26 }
 0x122   :  { %v1183_v49 = vpop.eup %1182  ;;  %v1052_v30 = vpack.c.bf16 %v1179_v29, %v1181_v41  ;;  %1196 = vrcp.f32 %v700_v34 }
 0x123   :  { %v1185_v7 = vpop.eup %1184  ;;  %v699_v32 = vadd.f32 1.0, %v1183_v49  ;;  %1051 = vmatpush3.bf16.msra.mxu1 %v1050_v18 }
 0x124   :  { %v1187_v33 = vpop.eup %1186  ;;  %v702_v24 = vadd.f32 1.0, %v1185_v7  ;;  %1053 = vmatprep.subr.bf16.mxu1 %v1052_v30 }
 0x125   :  { %v1189_v8 = vpop.eup %1188  ;;  %1198 = vrcp.f32 %v699_v32 }
 0x126   :  { %v1191_v53 = vpop.eup %1190  ;;  %v1056_v57 = vpack.c.bf16 %v1187_v33, %v1189_v8  ;;  %1200 = vrcp.f32 %v702_v24 }
 0x127   :  { %v701_v62 = vadd.f32 1.0, %v1191_v53  ;;  %1055 = vmatpush3.bf16.msra.mxu1 %v1054_v40  ;;  %v1193_v31 = vpop.eup %1192 }
 0x128   :  { %1057 = vmatprep.subr.bf16.mxu1 %v1056_v57 }
 0x129   :  { %1202 = vrcp.f32 %v701_v62 }
 0x12b   :  { %v1195_v25 = vpop.eup %1194  ;;  %1059 = vmatpush3.bf16.msra.mxu1 %v1058_v56  ;;  %v770_v56 = vpop.permute.xlu0 %769 }
 0x12c   :  { %v1060_v2 = vpack.c.bf16 %v1193_v31, %v1195_v25  ;;  %v1197_v10 = vpop.eup %1196 }
 0x12e   :  { %1061 = vmatprep.subr.bf16.mxu1 %v1060_v2 }
 0x12f   :  { %v1199_v18 = vpop.eup %1198  ;;  %1063 = vmatpush3.bf16.msra.mxu1 %v1062_v6 }
 0x130   :  { %v1064_v38 = vpack.c.bf16 %v1197_v10, %v1199_v18  ;;  %v1201_v42 = vpop.eup %1200 }
 0x132   :  { %1065 = vmatprep.subr.bf16.mxu1 %v1064_v38 }
 0x133   :  { %v1203_v27 = vpop.eup %1202  ;;  %1067 = vmatpush3.bf16.msra.mxu1 %v1066_v28 }
 0x134   :  { %v1068_v35 = vpack.c.bf16 %v1201_v42, %v1203_v27 }
 0x136   :  { %1069 = vmatprep.subr.bf16.mxu1 %v1068_v35 }
 0x137   :  { %1071 = vmatpush3.bf16.msra.mxu1 %v1070_v46 }
 0x13a   :  { %837 = vmatmul.mubr.f32.vlgmr.msra.gmra.mrb[0].mxu1 %v86_v37 }
 0x20d   :  { %v987_v40 = vpop.f32.mrb[0].mxu1 }
 0x20e   :  { %v988_v48 = vpop.f32.mrb[1].mxu1 }
 0x20f   :  { %v989_v52 = vadd.f32 %v988_v48, %v987_v40 }
 0x211   :  { %v839_v63 = vadd.f32 %v989_v52, %v770_v56 }
 0x213   :  { %842 = vst [vmem:[#allocation2] sm:$0x7f] %v839_v63 }
 0x214   :  { %1215 = shalt.err (!%p1212_p4)
}
 0x215   :  { %s1216_s3 = scalar_lea.hbm %s1633_s5, 128 }
 0x216   :  { %p1217_p5 = scmp.ne.s32.totalorder %s1633_s5, %s1216_s3  ;;  %p1220_p6 = scmp.lt.u32.totalorder %s1216_s3, %s1633_s5 }
 0x218   :  { %p1222_p7 = pnand %p1220_p6, %p1217_p5 }
 0x21a   :  { %1225 = shalt.err (!%p1222_p7)
}
 0x21b   :  { %852 = dma.vmem_to_hbm [thread:$0]  %s850_s22, 128, %s1633_s5, [#allocation3]  }
 0x21c   :  { %1226 = dma.done.wait [#allocation3], 128  }
 0x21d   :  { %1227 = vsyncadd [#allocation3], 4294967168 }
 0x21e   :  { %856 = vsyncpa [#allocation3], 1 }

</bundles_post_ra>
